<compile_context>
chip_gen: v5e
topology: v5e:2x2
jax: 0.10.0
libtpu: 0.0.40
codegen_flags: <defaults>
</compile_context>

<pallas_src>
import numpy as np
import jax
import jax.numpy as jnp
from jax.experimental import pallas as pl
from jax.experimental.pallas import tpu as pltpu

EPS = np.finfo(np.float32).tiny  # 1.1754944e-38


def _safelog_kernel(t_ref, o_ref):
    # Clamp + log in f32 (eps is sub-normal range for fp16; explicit upcast
    # also avoids surprise per-vreg casts on v5e), downcast on store.
    t = t_ref[...].astype(jnp.float32)
    y = jnp.log(jnp.maximum(jnp.float32(EPS), t))
    o_ref[...] = y.astype(o_ref.dtype)


def _round_up(x: int, m: int) -> int:
    return -(-x // m) * m


def safe_log(t: jax.Array, *, lane: int = 128,
             target_block_bytes: int = 2 << 20,
             min_grid_steps: int = 8) -> jax.Array:
    """Elementwise log(max(eps, t)) on TPU via Pallas. Any shape / float dtype."""
    orig_shape = t.shape
    orig_dtype = t.dtype
    n = t.size
    if n == 0:
        return t

    itemsize = jnp.dtype(orig_dtype).itemsize
    flat = t.reshape(-1)

    # --- tile selection: ~2 MiB lane-dense blocks, multiple of 8 sublanes,
    #     but keep >= min_grid_steps grid steps so both v7x TCs get work.
    rows_est = -(-n // lane)
    tile_rows = max(8, (target_block_bytes // (lane * itemsize)) // 8 * 8)
    tile_rows = min(tile_rows, max(8, _round_up(-(-rows_est // min_grid_steps), 8)))
    tile_rows = min(tile_rows, _round_up(rows_est, 8))

    pad_elems = (-n) % lane
    if pad_elems == 0:
        # Fast path: contiguous zero-copy reshape, no extra HBM traffic.
        # Uneven rows vs. tile_rows -> Pallas partial last block (writes masked).
        rows = n // lane
        slab = flat.reshape(rows, lane)
        padded = False
    else:
        # Slow path (numel not a multiple of 128): pad tail up to a full tile.
        # Pad value 1.0 -> log(1) = 0; padded outputs are sliced away.
        rows = _round_up(rows_est, tile_rows)
        slab = jnp.pad(flat, (0, rows * lane - n),
                       constant_values=1.0).reshape(rows, lane)
        padded = True

    grid = (pl.cdiv(rows, tile_rows),)

    out = pl.pallas_call(
        _safelog_kernel,
        out_shape=jax.ShapeDtypeStruct((rows, lane), orig_dtype),
        grid_spec=pltpu.PrefetchScalarGridSpec(
            num_scalar_prefetch=0,
            grid=grid,
            in_specs=[pl.BlockSpec((tile_rows, lane), lambda i: (i, 0))],
            out_specs=pl.BlockSpec((tile_rows, lane), lambda i: (i, 0)),
        ),
        compiler_params=pltpu.CompilerParams(
            dimension_semantics=("parallel",),
            vmem_limit_bytes=32 << 20,
        ),
    )(slab)

    if padded:
        return out.reshape(-1)[:n].reshape(orig_shape)
    return out.reshape(orig_shape)


if __name__ == "__main__":
    key = jax.random.PRNGKey(0)
    # NCHW input, small shape; include zero and negative values to hit the clamp.
    x = jax.random.normal(key, (2, 4, 16, 16), dtype=jnp.float32)
    x = x.at[0, 0, 0, 0].set(0.0)
    x = x.at[0, 0, 0, 1].set(-3.0)

    y = jax.block_until_ready(safe_log(x))
    ref = jnp.log(jnp.maximum(jnp.float32(EPS), x))
    np.testing.assert_allclose(np.asarray(y), np.asarray(ref), rtol=1e-6, atol=1e-6)

    # Also exercise the padded (numel % 128 != 0) path.
    x2 = jax.random.normal(jax.random.PRNGKey(1), (3, 5, 7), dtype=jnp.float32)
    y2 = jax.block_until_ready(safe_log(x2))
    ref2 = jnp.log(jnp.maximum(jnp.float32(EPS), x2))
    np.testing.assert_allclose(np.asarray(y2), np.asarray(ref2), rtol=1e-6, atol=1e-6)

    print("KERNEL_OK")
</pallas_src>

<mosaic_0001>
module attributes {stable_mosaic.version = 11 : i64} {
  func.func @_safelog_kernel(%arg0: i32, %arg1: memref<8x128xf32, #tpu.memory_space<vmem>>, %arg2: memref<8x128xf32, #tpu.memory_space<vmem>>) attributes {dimension_semantics = [#tpu.dimension_semantics<parallel>], iteration_bounds = array<i64: 2>, scalar_prefetch = 0 : i64, scratch_operands = 0 : i64, tpu.core_type = #tpu.core_type<tc>, window_params = [{transform_indices = @transform_0, window_bounds = array<i64: 8, 128>}, {transform_indices = @transform_1, window_bounds = array<i64: 8, 128>}]} {
    %c0 = arith.constant 0 : index
    %c0_0 = arith.constant 0 : index
    %0 = vector.load %arg1[%c0, %c0_0] : memref<8x128xf32, #tpu.memory_space<vmem>>, vector<8x128xf32>
    %cst = arith.constant 1.17549435E-38 : f32
    %1 = vector.broadcast %cst : f32 to vector<8x128xf32>
    %2 = arith.maximumf %1, %0 : vector<8x128xf32>
    %3 = math.log %2 : vector<8x128xf32>
    %c0_1 = arith.constant 0 : index
    %c0_2 = arith.constant 0 : index
    %4 = vector.load %arg2[%c0_1, %c0_2] : memref<8x128xf32, #tpu.memory_space<vmem>>, vector<8x128xf32>
    tpu.vector_store %arg2[%c0_1, %c0_2], %3 {strides = array<i32>} : memref<8x128xf32, #tpu.memory_space<vmem>>, vector<8x128xf32>,
    return
  }
  func.func @transform_0(%arg0: i32) -> (i32, i32) {
    %c0_i32 = arith.constant 0 : i32
    %c0_i32_0 = arith.constant 0 : i32
    return %arg0, %c0_i32 : i32, i32
  }
  func.func @transform_1(%arg0: i32) -> (i32, i32) {
    %c0_i32 = arith.constant 0 : i32
    %c0_i32_0 = arith.constant 0 : i32
    return %arg0, %c0_i32 : i32, i32
  }
}

</mosaic_0001>

<bundles_post_ra>
// kernel: tpu_custom_call.1
= control target key start
LH: loop header
LB: loop body
LE: loop exit
PB: predicated region body
PF: predicated region fallthrough
CT: control target
= control target key end

     0   :  { %6 = vsyncpa [#allocation3], 0  ;;  %s520_s0 = inlined_call_operand.hbm [shape: f32[16,128], index: 0, kind: input, shape index: {}]   ;;  %s521_s1 = inlined_call_operand.hbm [shape: f32[16,128], index: 1, kind: output, shape index: {}]  }
   0x1   :  { %8 = vsyncpa [#allocation3 + $0x1], 0 }
   0x2   :  { %9 = vsyncpa [#allocation4], 0 }
   0x3   :  { %11 = vsyncpa [#allocation4 + $0x1], 0  ;;  %s393_s6 = smov 0   ;;  %s395_s7 = smov 0  }
   0x4   :  { %s397_s8 = smov 0   ;;  %s399_s9 = smov 0  }
   0x5 LB: > { %s414_s10 = sadd.s32 4294967295, %s381_s9   ;;  %s225_s11 = sadd.s32 4294967294, %s381_s9   ;;  %s381_s9 = sphi %s399_s9, %s531_s9   ;;  %s377_s8 = sphi %s397_s8, %s530_s8   ;;  %s373_s7 = sphi %s395_s7, %s529_s7   ;;  %s369_s6 = sphi %s393_s6, %s528_s6  }
   0x6   : > { %s418_s12 = sadd.s32 1, %s381_s9   ;;  %s24_s13 = sadd.s32 1, %s377_s8 }
   0x7   : > { %s21_s14 = ssub.s32 %s381_s9, %s418_s12  ;;  %p31_p0 = scmp.ne.s32.totalorder %s377_s8, %s373_s7 }
   0x8   : > { %p22_p1 = scmp.eq.s32.totalorder %s21_s14, 0  ;;  %p32_p2 = scmp.eq.s32.totalorder %s381_s9, 0 }
   0x9   : > { %p37_p3 = scmp.ne.s32.totalorder %s373_s7, %s369_s6  ;;  %p38_p4 = scmp.eq.s32.totalorder %s414_s10, 0 }
   0xa   : > { %s430_s15 = scalar_select %p22_p1, %s377_s8, %s24_s13  }
   0xb   : > { %p432_p5 = por %p32_p2, %p31_p0  ;;  %p436_p6 = por %p38_p4, %p37_p3 }
   0xc   : > { %p61_p7 = scmp.eq.s32.totalorder %s414_s10, 1  ;;  %p67_p8 = scmp.eq.s32.totalorder %s225_s11, 1 }
   0xd   : > { %p249_p10 = scmp.lt.s32.totalorder %s381_s9, 2  ;;  %s87_s20 = sand.u32 1, %s377_s8  }
   0xe   : > { %p443_p11 = por %p61_p7, %p31_p0  ;;  %p447_p12 = por %p67_p8, %p37_p3 }
   0xf   : > { %s229_s21 = sshll.u32 %s381_s9, 3  ;;  %s228_s22 = sshll.u32 %s87_s20, 3 }
  0x10   : > { %s95_s25 = scalar_lea.hbm %s520_s0, %s229_s21  ;;  %s91_s27 = scalar_lea.vmem [#allocation2], %s228_s22 }
  0x11   : > { %s97_s26 = sshll.u32 %s95_s25, 4  ;;  %s99_s28 = sshll.u32 %s91_s27, 4  ;;  %s98_s26 = int_to_ptr.hbm [resolvable:$true] %s97_s26  ;;  %s100_s28 = int_to_ptr.vmem [resolvable:$true] %s99_s28 }
  0x12   : > { %p458_p13 = pnand %p249_p10, %p432_p5  ;;  %p230_p0 = scmp.ge.s32.totalorder %s381_s9, 1 }
  0x13   : > { %p104_p1 = scmp.lt.s32.totalorder %s381_s9, 3  ;;  %s88_s30 = scalar_lea.sflag [#allocation3], %s87_s20 }
  0x14   : > { %s285_s2 = sshra.s32 %s98_s26, 4  ;;  %p289_p3 = pneg %p458_p13  ;;  %s286_s2 = int_to_ptr.hbm [resolvable:$true] %s285_s2 }
  0x15   : > { %s287_s3 = scalar_lea.hbm %s286_s2, 8  ;;  %s292_s11 = scalar_lea.hbm %s520_s0, 16 }
  0x16   : > { %p288_p2 = scmp.ne.s32.totalorder %s286_s2, %s287_s3  ;;  %p293_p5 = scmp.lt.s32.totalorder %s286_s2, %s520_s0 }
  0x17   : > { %p294_p8 = scmp.lt.s32.totalorder %s292_s11, %s287_s3 }
  0x18   : > { %p290_p4 = pnand %p289_p3, %p288_p2 }
  0x19   : > { %p295_p10 = por %p294_p8, %p293_p5 }
  0x1a   : > { %p291_p7 = pneg %p290_p4 }
  0x1c   : > { %p296_p9 = pnand %p295_p10, %p291_p7 }
  0x1e   : > { %299 = shalt.err (!%p296_p9)
}
  0x1f   : > { %244 = dma.hbm_to_vmem [thread:$0]  (!%p458_p13), %s98_s26, 128, %s100_s28, %s88_s30  }
  0x20   : > { %p105_p2 = pnand %p230_p0, %p104_p1 }
  0x21   : > { %s479_s16 = sand.u32 (!%p105_p2), 1, %s373_s7  }
  0x22   : > { %108 = sbr.rel (%p105_p2) target bundleno = 55 (0x37), region = 24  ;;  %s231_s20 = sshll.u32 (!%p105_p2), %s479_s16, 3 }
  0x23   : > { %s111_s21 = scalar_lea.sflag (!%p105_p2), [#allocation3], %s479_s16  ;;  %s114_s22 = scalar_lea.vmem (!%p105_p2), [#allocation2], %s231_s20 }
  0x27   : > { %360 = dma.done.wait (%p436_p6), %s111_s21, 128  }
  0x28   : > { %362 = vsyncadd (%p436_p6), %s111_s21, 4294967168  ;;  %v134_v0 = vld [vmem:[%s114_s22] sm:$0xff]  ;;  %s234_s23 = sshll.u32 %s414_s10, 3  ;;  %s133_s27 = scalar_lea.vmem [#allocation5], %s231_s20 }
  0x29   : > { %v135_v1 = vmax.f32 %v134_v0, 1.1754944e-38  ;;  %s150_s26 = scalar_lea.hbm %s521_s1, %s234_s23  ;;  %s152_s28 = sshll.u32 %s133_s27, 4  ;;  %s153_s28 = int_to_ptr.vmem [resolvable:$true] %s152_s28 }
  0x2a   : > { %s154_s29 = sshll.u32 %s150_s26, 4  ;;  %s140_s17 = scalar_lea.sflag [#allocation4], %s479_s16  ;;  %s155_s29 = int_to_ptr.hbm [resolvable:$true] %s154_s29 }
  0x2b   : > { %283 = vlog2.f32 %v135_v1  ;;  %s329_s30 = sshra.s32 %s155_s29, 4  ;;  %s335_s4 = scalar_lea.hbm %s521_s1, 16  ;;  %s330_s30 = int_to_ptr.hbm [resolvable:$true] %s329_s30 }
  0x2c   : > { %s331_s2 = scalar_lea.hbm %s330_s30, 8  ;;  %p336_p0 = scmp.lt.s32.totalorder %s330_s30, %s521_s1 }
  0x2d   : > { %p332_p6 = scmp.ne.s32.totalorder %s330_s30, %s331_s2  ;;  %p337_p1 = scmp.lt.s32.totalorder %s335_s4, %s331_s2 }
  0x2f   : > { %p333_p9 = pnand %p332_p6, %p443_p11  ;;  %p338_p3 = por %p337_p1, %p336_p0 }
  0x31   : > { %v284_v2 = vpop.eup %283  ;;  %p334_p13 = pneg %p333_p9 }
  0x32   : > { %v137_v3 = vmul.f32 0.6931472, %v284_v2 }
  0x33   : > { %p339_p4 = pnand %p338_p3, %p334_p13 }
  0x34   : > { %138 = vst [vmem:[%s133_s27] sm:$0xff] %v137_v3 }
  0x35   : > { %342 = shalt.err (!%p339_p4)
}
  0x36   : > { %239 = dma.vmem_to_hbm [thread:$0]  (%p443_p11), %s153_s28, 128, %s155_s29, %s140_s17  }
  0x37 PF: > { %s166_s13 = sand.u32 1, %s369_s6   ;;  %p527_p7 = scmp.ge.s32.totalorder %s381_s9, 2 }
  0x38   : > { %s167_s14 = scalar_lea.sflag [#allocation4], %s166_s13 }
  0x39   : > { %p246_p5 = pnand %p527_p7, %p447_p12 }
  0x3b   : > { %p247_p8 = pneg %p246_p5 }
  0x3d   : > { %364 = dma.done.wait (%p247_p8), %s167_s14, 128  }
  0x3e   : > { %366 = vsyncadd (%p247_p8), %s167_s14, 4294967168  ;;  %p14_p10 = scmp.ge.s32.totalorder %s418_s12, 4   ;;  %s528_s6 = smov %s373_s7 }
  0x3f   : > { %s529_s7 = smov %s377_s8  ;;  %s530_s8 = smov %s430_s15 }
  0x40   : > { %s531_s9 = smov %s418_s12  ;;  %16 = sbr.rel (!%p14_p10) target bundleno = 5 (0x5), region = 69 }
  0x45   :  { %173 = vsyncpa [#allocation3], 1 }
  0x46   :  { %175 = vsyncpa [#allocation3 + $0x1], 1 }
  0x47   :  { %176 = vsyncpa [#allocation4], 1 }
  0x48   :  { %178 = vsyncpa [#allocation4 + $0x1], 1 }

</bundles_post_ra>
